<compile_context>
chip_gen: v7x
topology: tpu7x:2x2x1
jax: 0.10.0
libtpu: 0.0.40
codegen_flags: <defaults>
</compile_context>

<pallas_src>
import functools

import jax
import jax.numpy as jnp
import numpy as np
from jax import lax
from jax.experimental import pallas as pl
from jax.experimental.pallas import tpu as pltpu


# ----------------------------------------------------------------------------
# small helpers
# ----------------------------------------------------------------------------
def _round_up(x, m):
    return ((x + m - 1) // m) * m


def _cdiv(a, b):
    return -(-a // b)


def _vmem_capacity_bytes():
    """Physical per-core VMEM; conservative 64 MiB (v7x) if the query fails."""
    try:
        cap = getattr(pltpu.get_tpu_info(), "vmem_capacity_bytes", None)
        if cap:
            return int(cap)
    except Exception:
        pass
    return 64 * 1024 * 1024


def _choose_tiling(hw, max_tile_lanes):
    """(tile_hw, hw_pad, n_tiles): tile_hw a multiple of 128, hw_pad = tile_hw*n_tiles >= hw."""
    max_tile = max(128, (max_tile_lanes // 128) * 128)
    if hw <= max_tile:
        tile = _round_up(hw, 128)
        return tile, tile, 1
    n_tiles = _cdiv(hw, max_tile)
    tile = _round_up(_cdiv(hw, n_tiles), 128)
    return tile, tile * n_tiles, n_tiles


def _se_gate(mean, w1, w2t):
    """SE head without matmuls/transposes.
    mean: (Cout,1); w1: (Cout,Cmid) (original orient.); w2t: (Cout,Cmid) (= w2.T).
    a1[m] = relu(sum_c w1[c,m]*mean[c]);  z[c] = sum_m w2[m,c]*a1[m]."""
    a1 = jnp.maximum(jnp.sum(w1 * mean, axis=0, keepdims=True), 0.0)   # (1, Cmid)
    z = jnp.sum(w2t * a1, axis=1, keepdims=True)                       # (Cout, 1)
    return 1.0 + jax.nn.sigmoid(z)                                     # feat*atten + feat


# ----------------------------------------------------------------------------
# Fused single-pass kernel: conv+BN+ReLU, pooled sums, SE gate, apply gate.
# Output block (1, Cout, hw_pad) is VMEM-resident across the HW-tile sweep.
# ----------------------------------------------------------------------------
def _ffm_fused_kernel(xsp_ref, xcp_ref, wsp_ref, wcp_ref, b_ref, w1_ref, w2t_ref,
                      out_ref, sum_ref, *, tile_hw, n_tiles, hw_valid):
    t = pl.program_id(1)

    @pl.when(t == 0)
    def _init():
        sum_ref[...] = jnp.zeros_like(sum_ref)

    # 1x1 conv (concat avoided by splitting the weight) + folded-BN bias + ReLU
    acc = jnp.dot(wsp_ref[...], xsp_ref[0], preferred_element_type=jnp.float32)
    acc = acc + jnp.dot(wcp_ref[...], xcp_ref[0], preferred_element_type=jnp.float32)
    feat = jnp.maximum(acc + b_ref[...], 0.0)                     # (Cout, tile_hw) f32

    off = pl.multiple_of(t * tile_hw, 128)
    out_ref[0, :, pl.ds(off, tile_hw)] = feat.astype(out_ref.dtype)   # pre-gate slab

    if hw_valid != tile_hw * n_tiles:          # padded tail: mask out of the pooled sum
        lane = lax.broadcasted_iota(jnp.int32, feat.shape, 1) + t * tile_hw
        feat = jnp.where(lane < hw_valid, feat, 0.0)
    sum_ref[...] = sum_ref[...] + jnp.sum(feat, axis=1, keepdims=True)

    @pl.when(t == n_tiles - 1)
    def _finalize():
        gate = _se_gate(sum_ref[...] * (1.0 / hw_valid), w1_ref[...], w2t_ref[...])

        # Gate the resident slab in place (VMEM-only traffic), chunk by chunk.
        @pl.loop(0, n_tiles)
        def _apply(s):
            o = pl.multiple_of(s * tile_hw, 128)
            blk = out_ref[0, :, pl.ds(o, tile_hw)].astype(jnp.float32)
            out_ref[0, :, pl.ds(o, tile_hw)] = (blk * gate).astype(out_ref.dtype)


# ----------------------------------------------------------------------------
# Two-pass fallback (very large images only): pass 1 = feat(bf16) + pooled sums,
# pass 2 = in-kernel SE gate + apply (no host-side SE head, no extra dispatches).
# ----------------------------------------------------------------------------
def _ffm_feat_kernel(xsp_ref, xcp_ref, wsp_ref, wcp_ref, b_ref, feat_ref, sum_ref,
                     *, tile_hw, n_tiles, hw_valid):
    t = pl.program_id(1)

    @pl.when(t == 0)
    def _init():
        sum_ref[...] = jnp.zeros_like(sum_ref)

    acc = jnp.dot(wsp_ref[...], xsp_ref[0], preferred_element_type=jnp.float32)
    acc = acc + jnp.dot(wcp_ref[...], xcp_ref[0], preferred_element_type=jnp.float32)
    feat = jnp.maximum(acc + b_ref[...], 0.0)
    feat_ref[0] = feat.astype(feat_ref.dtype)

    if hw_valid != tile_hw * n_tiles:
        lane = lax.broadcasted_iota(jnp.int32, feat.shape, 1) + t * tile_hw
        feat = jnp.where(lane < hw_valid, feat, 0.0)
    sum_ref[0] = sum_ref[0] + jnp.sum(feat, axis=1, keepdims=True)


def _ffm_apply_kernel(sum_ref, w1_ref, w2t_ref, feat_ref, o_ref, *, hw_valid):
    # Recomputing the tiny gate per tile is free (VPU/XLU slack) and keeps both
    # grid axes "parallel" (megacore-safe).
    gate = _se_gate(sum_ref[0] * (1.0 / hw_valid), w1_ref[...], w2t_ref[...])
    o_ref[0] = (feat_ref[0].astype(jnp.float32) * gate).astype(o_ref.dtype)


# ----------------------------------------------------------------------------
# Wrapper
# ----------------------------------------------------------------------------
def feature_fusion(fsp, fcp, params, *, max_tile_lanes=None, out_dtype=jnp.float32,
                   force_two_pass=False):
    """fsp, fcp: NCHW float32. Returns NCHW `out_dtype` of shape (N, out_chan, H, W)."""
    w0, scale, bias, w1, w2 = params
    N, C_sp, H, W = fsp.shape
    C_cp = fcp.shape[1]
    Cout = w0.shape[1]
    Cmid = w1.shape[1]
    HW = H * W

    # Fold the eval-mode BN scale into the 1x1 conv weight; split the weight so
    # the channel concat never materializes.
    w0T = (w0 * scale).T                                      # (Cout, Cin)
    wsp = w0T[:, :C_sp].astype(jnp.float32)                   # (Cout, C_sp)
    wcp = w0T[:, C_sp:].astype(jnp.float32)                   # (Cout, C_cp)
    b = bias.reshape(Cout, 1).astype(jnp.float32)             # (Cout, 1)
    w1k = w1.astype(jnp.float32)                              # (Cout, Cmid)
    w2t = w2.T.astype(jnp.float32)                            # (Cout, Cmid)

    # Zero-copy layout: NCHW -> (N, C, HW); HW is the lane-dense last dim.
    xsp = fsp.reshape(N, C_sp, HW)
    xcp = fcp.reshape(N, C_cp, HW)

    # --- VMEM-budgeted HW tiling (review: >=32K-lane tiles, not 2048) ---------
    if max_tile_lanes is None:
        per_lane = 8 * (C_sp + C_cp) + 4 * Cout               # dbuf f32 in + f32 out slab
        max_tile_lanes = min(131072, max(8192, (12 << 20) // per_lane))
    tile_hw, hw_pad, n_tiles = _choose_tiling(HW, max_tile_lanes)

    if hw_pad != HW:
        pad = hw_pad - HW                                     # padded lanes are masked
        xsp = jnp.pad(xsp, ((0, 0), (0, 0), (0, pad)))        # out of the pooled mean
        xcp = jnp.pad(xcp, ((0, 0), (0, 0), (0, pad)))        # and sliced off below

    cap = _vmem_capacity_bytes()

    common_in_specs = [
        pl.BlockSpec((1, C_sp, tile_hw), lambda n, t: (n, 0, t)),
        pl.BlockSpec((1, C_cp, tile_hw), lambda n, t: (n, 0, t)),
        pl.BlockSpec((Cout, C_sp), lambda n, t: (0, 0)),
        pl.BlockSpec((Cout, C_cp), lambda n, t: (0, 0)),
        pl.BlockSpec((Cout, 1), lambda n, t: (0, 0)),
    ]
    se_specs = [
        pl.BlockSpec((Cout, Cmid), lambda n, t: (0, 0)),
        pl.BlockSpec((Cout, Cmid), lambda n, t: (0, 0)),
    ]

    # Fused-path VMEM estimate: resident out (double-buffered across n) + dbuf input tiles.
    fused_need = (2 * Cout * hw_pad * 4
                  + 2 * (C_sp + C_cp) * tile_hw * 4
                  + (1 << 20))
    fused_budget = int(0.70 * cap)             # ~45 MiB on v7x, ~90 MiB on v5e/v6e
    use_fused = (not force_two_pass) and (fused_need <= fused_budget)

    if use_fused:
        vmem_limit = int(min(cap - (4 << 20), max(fused_need + (8 << 20), 32 << 20)))
        kern = functools.partial(_ffm_fused_kernel, tile_hw=tile_hw,
                                 n_tiles=n_tiles, hw_valid=HW)
        out_flat = pl.pallas_call(
            kern,
            out_shape=jax.ShapeDtypeStruct((N, Cout, hw_pad), out_dtype),
            grid=(N, n_tiles),
            in_specs=common_in_specs + se_specs,
            out_specs=pl.BlockSpec((1, Cout, hw_pad), lambda n, t: (n, 0, 0)),
            scratch_shapes=[pltpu.VMEM((Cout, 1), jnp.float32)],
            compiler_params=pltpu.CompilerParams(
                dimension_semantics=("parallel", "arbitrary"),
                vmem_limit_bytes=vmem_limit),
        )(xsp, xcp, wsp, wcp, b, w1k, w2t)
    else:
        # ---------------- pass 1: feat (bf16 intermediate) + pooled sums ------
        p1_need = (2 * (C_sp + C_cp) * tile_hw * 4
                   + 2 * Cout * tile_hw * 2 + (1 << 20))
        vmem1 = int(min(cap - (4 << 20), max(p1_need + (8 << 20), 32 << 20)))
        kern1 = functools.partial(_ffm_feat_kernel, tile_hw=tile_hw,
                                  n_tiles=n_tiles, hw_valid=HW)
        feat, sums = pl.pallas_call(
            kern1,
            out_shape=(jax.ShapeDtypeStruct((N, Cout, hw_pad), jnp.bfloat16),
                       jax.ShapeDtypeStruct((N, Cout, 1), jnp.float32)),
            grid=(N, n_tiles),
            in_specs=common_in_specs,
            out_specs=(pl.BlockSpec((1, Cout, tile_hw), lambda n, t: (n, 0, t)),
                       pl.BlockSpec((1, Cout, 1), lambda n, t: (n, 0, 0))),
            compiler_params=pltpu.CompilerParams(
                dimension_semantics=("parallel", "arbitrary"),
                vmem_limit_bytes=vmem1),
        )(xsp, xcp, wsp, wcp, b)

        # ---------------- pass 2: in-kernel SE gate + apply -------------------
        p2_need = (2 * Cout * tile_hw * 2 + 2 * Cout * tile_hw * 4 + (1 << 20))
        vmem2 = int(min(cap - (4 << 20), max(p2_need + (8 << 20), 32 << 20)))
        kern2 = functools.partial(_ffm_apply_kernel, hw_valid=HW)
        out_flat = pl.pallas_call(
            kern2,
            out_shape=jax.ShapeDtypeStruct((N, Cout, hw_pad), out_dtype),
            grid=(N, n_tiles),
            in_specs=[pl.BlockSpec((1, Cout, 1), lambda n, t: (n, 0, 0))] + se_specs
                     + [pl.BlockSpec((1, Cout, tile_hw), lambda n, t: (n, 0, t))],
            out_specs=pl.BlockSpec((1, Cout, tile_hw), lambda n, t: (n, 0, t)),
            compiler_params=pltpu.CompilerParams(
                dimension_semantics=("parallel", "parallel"),
                vmem_limit_bytes=vmem2),
        )(sums, w1k, w2t, feat)

    if hw_pad != HW:
        out_flat = out_flat[:, :, :HW]
    return out_flat.reshape(N, Cout, H, W)


# ----------------------------------------------------------------------------
# Parameters & pure-JAX reference
# ----------------------------------------------------------------------------
def init_params(key, in_chan, out_chan):
    """Synthetic parameters matching the PyTorch module's shapes.
    kaiming_normal_(a=1) on a 1x1 conv => std = 1/sqrt(fan_in).
    BatchNorm2d in eval() with fresh running stats -> folded scale/bias."""
    k0, k1, k2 = jax.random.split(key, 3)
    w0 = jax.random.normal(k0, (in_chan, out_chan), jnp.float32) / np.sqrt(in_chan)
    w1 = jax.random.normal(k1, (out_chan, out_chan // 2), jnp.float32) / np.sqrt(out_chan)
    w2 = jax.random.normal(k2, (out_chan // 2, out_chan), jnp.float32) / np.sqrt(out_chan // 2)

    eps = 1e-5
    gamma = jnp.ones((1, out_chan), jnp.float32)
    beta = jnp.zeros((1, out_chan), jnp.float32)
    running_mean = jnp.zeros((1, out_chan), jnp.float32)
    running_var = jnp.ones((1, out_chan), jnp.float32)
    scale = gamma / jnp.sqrt(running_var + eps)
    bias = beta - running_mean * scale
    return (w0, scale, bias, w1, w2)


def reference(fsp, fcp, params):
    """Plain-JAX f32 reference (eval-mode PyTorch semantics)."""
    w0, scale, bias, w1, w2 = params
    fcat = jnp.concatenate([fsp, fcp], axis=1)                 # (N, Cin, H, W)
    x = jnp.transpose(fcat, (0, 2, 3, 1))                      # NHWC
    feat = jnp.maximum(jnp.dot(x, w0 * scale) + bias, 0.0)     # (N,H,W,Cout)
    atten = jnp.mean(feat, axis=(1, 2), keepdims=True)         # (N,1,1,Cout)
    a1 = jnp.maximum(atten @ w1, 0.0)
    a2 = jax.nn.sigmoid(a1 @ w2)
    out = feat * a2 + feat
    return jnp.transpose(out, (0, 3, 1, 2))                    # NCHW


if __name__ == "__main__":
    N, H, W = 2, 16, 16
    c_sp, c_cp = 4, 4
    in_chan = c_sp + c_cp              # 8
    out_chan = 8                       # out_chan // 2 == 4

    key = jax.random.PRNGKey(0)
    k_sp, k_cp, k_p = jax.random.split(key, 3)
    fsp = jax.random.normal(k_sp, (N, c_sp, H, W), jnp.float32)
    fcp = jax.random.normal(k_cp, (N, c_cp, H, W), jnp.float32)
    params = init_params(k_p, in_chan, out_chan)

    ref = jax.block_until_ready(reference(fsp, fcp, params))

    # Fused single-pass path; 128-lane tiles so HW=256 exercises the multi-tile
    # accumulation + in-place gating of the resident output slab.
    out = jax.block_until_ready(feature_fusion(fsp, fcp, params, max_tile_lanes=128))
    np.testing.assert_allclose(np.asarray(out), np.asarray(ref), rtol=1e-2, atol=1e-3)

    # Two-pass fallback path (used when the resident output would not fit VMEM).
    out2 = jax.block_until_ready(
        feature_fusion(fsp, fcp, params, max_tile_lanes=128, force_two_pass=True))
    np.testing.assert_allclose(np.asarray(out2), np.asarray(ref), rtol=1e-2, atol=1e-3)

    # Non-multiple-of-128 spatial size exercises the padded / masked-mean path.
    H2 = W2 = 10
    fsp2 = jax.random.normal(k_sp, (N, c_sp, H2, W2), jnp.float32)
    fcp2 = jax.random.normal(k_cp, (N, c_cp, H2, W2), jnp.float32)
    ref2 = jax.block_until_ready(reference(fsp2, fcp2, params))
    out3 = jax.block_until_ready(feature_fusion(fsp2, fcp2, params))
    np.testing.assert_allclose(np.asarray(out3), np.asarray(ref2), rtol=1e-2, atol=1e-3)

    print("KERNEL_OK")
</pallas_src>

<mosaic_0001>
module attributes {stable_mosaic.version = 11 : i64} {
  func.func @_ffm_fused_kernel(%arg0: i32, %arg1: i32, %arg2: memref<1x4x128xf32, #tpu.memory_space<vmem>>, %arg3: memref<1x4x128xf32, #tpu.memory_space<vmem>>, %arg4: memref<8x4xf32, #tpu.memory_space<vmem>>, %arg5: memref<8x4xf32, #tpu.memory_space<vmem>>, %arg6: memref<8x1xf32, #tpu.memory_space<vmem>>, %arg7: memref<8x4xf32, #tpu.memory_space<vmem>>, %arg8: memref<8x4xf32, #tpu.memory_space<vmem>>, %arg9: memref<1x8x256xf32, #tpu.memory_space<vmem>>, %arg10: memref<8x1xf32, #tpu.memory_space<vmem>>) attributes {dimension_semantics = [#tpu.dimension_semantics<parallel>, #tpu.dimension_semantics<arbitrary>], iteration_bounds = array<i64: 2, 2>, scalar_prefetch = 0 : i64, scratch_operands = 1 : i64, tpu.core_type = #tpu.core_type<tc>, window_params = [{transform_indices = @transform_0, window_bounds = array<i64: 1, 4, 128>}, {transform_indices = @transform_1, window_bounds = array<i64: 1, 4, 128>}, {pipeline_mode = #tpu.pipeline_mode<synchronous>, transform_indices = @transform_2, window_bounds = array<i64: 8, 4>}, {pipeline_mode = #tpu.pipeline_mode<synchronous>, transform_indices = @transform_3, window_bounds = array<i64: 8, 4>}, {pipeline_mode = #tpu.pipeline_mode<synchronous>, transform_indices = @transform_4, window_bounds = array<i64: 8, 1>}, {pipeline_mode = #tpu.pipeline_mode<synchronous>, transform_indices = @transform_5, window_bounds = array<i64: 8, 4>}, {pipeline_mode = #tpu.pipeline_mode<synchronous>, transform_indices = @transform_6, window_bounds = array<i64: 8, 4>}, {transform_indices = @transform_7, window_bounds = array<i64: 1, 8, 256>}]} {
    %c0_i32 = arith.constant 0 : i32
    %0 = arith.cmpi eq, %arg1, %c0_i32 : i32
    %1 = arith.extui %0 : i1 to i32
    %c0_i32_0 = arith.constant 0 : i32
    %2 = arith.cmpi ne, %1, %c0_i32_0 : i32
    scf.if %2 {
      %cst_22 = arith.constant 0.000000e+00 : f32
      %31 = vector.broadcast %cst_22 : f32 to vector<8x1xf32>
      %c0_23 = arith.constant 0 : index
      %c0_24 = arith.constant 0 : index
      %32 = vector.load %arg10[%c0_23, %c0_24] : memref<8x1xf32, #tpu.memory_space<vmem>>, vector<8x1xf32>
      tpu.vector_store %arg10[%c0_23, %c0_24], %31 {strides = array<i32>} : memref<8x1xf32, #tpu.memory_space<vmem>>, vector<8x1xf32>,
    } else {
    }
    %c0 = arith.constant 0 : index
    %c0_1 = arith.constant 0 : index
    %3 = vector.load %arg4[%c0, %c0_1] : memref<8x4xf32, #tpu.memory_space<vmem>>, vector<8x4xf32>
    %c0_2 = arith.constant 0 : index
    %c0_3 = arith.constant 0 : index
    %c0_4 = arith.constant 0 : index
    %4 = vector.load %arg2[%c0_2, %c0_3, %c0_4] : memref<1x4x128xf32, #tpu.memory_space<vmem>>, vector<1x4x128xf32>
    %5 = vector.shape_cast %4 : vector<1x4x128xf32> to vector<4x128xf32>
    %cst = arith.constant dense<0.000000e+00> : vector<8x128xf32>
    %6 = tpu.matmul %3, %5, %cst {dimension_numbers = #tpu.dot_dimension_numbers<[1], [0], [0], [1], [0, 0, 1, 1], [], []>} : vector<8x4xf32>, vector<4x128xf32>, vector<8x128xf32> -> vector<8x128xf32>
    %c0_5 = arith.constant 0 : index
    %c0_6 = arith.constant 0 : index
    %7 = vector.load %arg5[%c0_5, %c0_6] : memref<8x4xf32, #tpu.memory_space<vmem>>, vector<8x4xf32>
    %c0_7 = arith.constant 0 : index
    %c0_8 = arith.constant 0 : index
    %c0_9 = arith.constant 0 : index
    %8 = vector.load %arg3[%c0_7, %c0_8, %c0_9] : memref<1x4x128xf32, #tpu.memory_space<vmem>>, vector<1x4x128xf32>
    %9 = vector.shape_cast %8 : vector<1x4x128xf32> to vector<4x128xf32>
    %cst_10 = arith.constant dense<0.000000e+00> : vector<8x128xf32>
    %10 = tpu.matmul %7, %9, %cst_10 {dimension_numbers = #tpu.dot_dimension_numbers<[1], [0], [0], [1], [0, 0, 1, 1], [], []>} : vector<8x4xf32>, vector<4x128xf32>, vector<8x128xf32> -> vector<8x128xf32>
    %11 = arith.addf %6, %10 : vector<8x128xf32>
    %c0_11 = arith.constant 0 : index
    %c0_12 = arith.constant 0 : index
    %12 = vector.load %arg6[%c0_11, %c0_12] : memref<8x1xf32, #tpu.memory_space<vmem>>, vector<8x1xf32>
    %13 = vector.broadcast %12 : vector<8x1xf32> to vector<8x128xf32>
    %14 = arith.addf %11, %13 : vector<8x128xf32>
    %cst_13 = arith.constant 0.000000e+00 : f32
    %15 = vector.broadcast %cst_13 : f32 to vector<8x128xf32>
    %16 = arith.maximumf %14, %15 : vector<8x128xf32>
    %c128_i32 = arith.constant 128 : i32
    %17 = arith.muli %arg1, %c128_i32 : i32
    %18 = tpu.assume_multiple %17, 128 : i32
    %c0_14 = arith.constant 0 : index
    %c0_15 = arith.constant 0 : index
    %19 = arith.index_cast %18 : i32 to index
    %20 = vector.load %arg9[%c0_14, %c0_15, %19] : memref<1x8x256xf32, #tpu.memory_space<vmem>>, vector<1x8x128xf32>
    %21 = vector.shape_cast %20 : vector<1x8x128xf32> to vector<8x128xf32>
    %22 = vector.shape_cast %16 : vector<8x128xf32> to vector<1x8x128xf32>
    tpu.vector_store %arg9[%c0_14, %c0_15, %19], %22 {strides = array<i32>} : memref<1x8x256xf32, #tpu.memory_space<vmem>>, vector<1x8x128xf32>,
    %c0_16 = arith.constant 0 : index
    %c0_17 = arith.constant 0 : index
    %23 = vector.load %arg10[%c0_16, %c0_17] : memref<8x1xf32, #tpu.memory_space<vmem>>, vector<8x1xf32>
    %cst_18 = arith.constant dense<0.000000e+00> : vector<8xf32>
    %24 = vector.multi_reduction <add>, %16, %cst_18 [1] : vector<8x128xf32> to vector<8xf32>
    %25 = vector.shape_cast %24 : vector<8xf32> to vector<8x1xf32>
    %26 = arith.addf %23, %25 : vector<8x1xf32>
    %c0_19 = arith.constant 0 : index
    %c0_20 = arith.constant 0 : index
    %27 = vector.load %arg10[%c0_19, %c0_20] : memref<8x1xf32, #tpu.memory_space<vmem>>, vector<8x1xf32>
    tpu.vector_store %arg10[%c0_19, %c0_20], %26 {strides = array<i32>} : memref<8x1xf32, #tpu.memory_space<vmem>>, vector<8x1xf32>,
    %c1_i32 = arith.constant 1 : i32
    %28 = arith.cmpi eq, %arg1, %c1_i32 : i32
    %29 = arith.extui %28 : i1 to i32
    %c0_i32_21 = arith.constant 0 : i32
    %30 = arith.cmpi ne, %29, %c0_i32_21 : i32
    scf.if %30 {
      %c0_22 = arith.constant 0 : index
      %c0_23 = arith.constant 0 : index
      %31 = vector.load %arg10[%c0_22, %c0_23] : memref<8x1xf32, #tpu.memory_space<vmem>>, vector<8x1xf32>
      %cst_24 = arith.constant 3.906250e-03 : f32
      %32 = vector.broadcast %cst_24 : f32 to vector<8x1xf32>
      %33 = arith.mulf %31, %32 : vector<8x1xf32>
      %c0_25 = arith.constant 0 : index
      %c0_26 = arith.constant 0 : index
      %34 = vector.load %arg7[%c0_25, %c0_26] : memref<8x4xf32, #tpu.memory_space<vmem>>, vector<8x4xf32>
      %c0_27 = arith.constant 0 : index
      %c0_28 = arith.constant 0 : index
      %35 = vector.load %arg8[%c0_27, %c0_28] : memref<8x4xf32, #tpu.memory_space<vmem>>, vector<8x4xf32>
      %36 = vector.broadcast %33 : vector<8x1xf32> to vector<8x4xf32>
      %37 = arith.mulf %34, %36 : vector<8x4xf32>
      %cst_29 = arith.constant dense<0.000000e+00> : vector<4xf32>
      %38 = vector.multi_reduction <add>, %37, %cst_29 [0] : vector<8x4xf32> to vector<4xf32>
      %39 = vector.shape_cast %38 : vector<4xf32> to vector<1x4xf32>
      %cst_30 = arith.constant 0.000000e+00 : f32
      %40 = vector.broadcast %cst_30 : f32 to vector<1x4xf32>
      %41 = arith.maximumf %39, %40 : vector<1x4xf32>
      %42 = vector.broadcast %41 : vector<1x4xf32> to vector<8x4xf32>
      %43 = arith.mulf %35, %42 : vector<8x4xf32>
      %cst_31 = arith.constant dense<0.000000e+00> : vector<8xf32>
      %44 = vector.multi_reduction <add>, %43, %cst_31 [1] : vector<8x4xf32> to vector<8xf32>
      %45 = vector.shape_cast %44 : vector<8xf32> to vector<8x1xf32>
      %46 = arith.negf %45 : vector<8x1xf32>
      %47 = math.exp %46 : vector<8x1xf32>
      %cst_32 = arith.constant 1.000000e+00 : f32
      %48 = vector.broadcast %cst_32 : f32 to vector<8x1xf32>
      %49 = arith.addf %48, %47 : vector<8x1xf32>
      %50 = arith.divf %48, %49 : vector<8x1xf32>
      %cst_33 = arith.constant 1.000000e+00 : f32
      %51 = vector.broadcast %cst_33 : f32 to vector<8x1xf32>
      %52 = arith.addf %51, %50 : vector<8x1xf32>
      %c0_i32_34 = arith.constant 0 : i32
      %c2_i32 = arith.constant 2 : i32
      %53 = arith.addi %c0_i32_34, %c2_i32 : i32
      %c1_i32_35 = arith.constant 1 : i32
      scf.for %arg11 = %c0_i32_34 to %53 step %c1_i32_35  : i32 {
        %c1_i32_37 = arith.constant 1 : i32
        %54 = arith.muli %arg11, %c1_i32_37 : i32
        %c0_i32_38 = arith.constant 0 : i32
        %55 = arith.addi %c0_i32_38, %54 : i32
        %c128_i32_39 = arith.constant 128 : i32
        %56 = arith.muli %55, %c128_i32_39 : i32
        %57 = tpu.assume_multiple %56, 128 : i32
        %c0_40 = arith.constant 0 : index
        %c0_41 = arith.constant 0 : index
        %58 = arith.index_cast %57 : i32 to index
        %59 = vector.load %arg9[%c0_40, %c0_41, %58] : memref<1x8x256xf32, #tpu.memory_space<vmem>>, vector<1x8x128xf32>
        %60 = vector.shape_cast %59 : vector<1x8x128xf32> to vector<8x128xf32>
        %61 = vector.broadcast %52 : vector<8x1xf32> to vector<8x128xf32>
        %62 = arith.mulf %60, %61 : vector<8x128xf32>
        %c0_42 = arith.constant 0 : index
        %c0_43 = arith.constant 0 : index
        %63 = arith.index_cast %57 : i32 to index
        %64 = vector.load %arg9[%c0_42, %c0_43, %63] : memref<1x8x256xf32, #tpu.memory_space<vmem>>, vector<1x8x128xf32>
        %65 = vector.shape_cast %64 : vector<1x8x128xf32> to vector<8x128xf32>
        %66 = vector.shape_cast %62 : vector<8x128xf32> to vector<1x8x128xf32>
        tpu.vector_store %arg9[%c0_42, %c0_43, %63], %66 {strides = array<i32>} : memref<1x8x256xf32, #tpu.memory_space<vmem>>, vector<1x8x128xf32>,
      }
      %c2_i32_36 = arith.constant 2 : i32
    } else {
    }
    return
  }
  func.func @transform_0(%arg0: i32, %arg1: i32) -> (i32, i32, i32) {
    %c0_i32 = arith.constant 0 : i32
    %c0_i32_0 = arith.constant 0 : i32
    return %arg0, %c0_i32, %arg1 : i32, i32, i32
  }
  func.func @transform_1(%arg0: i32, %arg1: i32) -> (i32, i32, i32) {
    %c0_i32 = arith.constant 0 : i32
    %c0_i32_0 = arith.constant 0 : i32
    return %arg0, %c0_i32, %arg1 : i32, i32, i32
  }
  func.func @transform_2(%arg0: i32, %arg1: i32) -> (i32, i32) {
    %c0_i32 = arith.constant 0 : i32
    %c0_i32_0 = arith.constant 0 : i32
    %c0_i32_1 = arith.constant 0 : i32
    return %c0_i32, %c0_i32_0 : i32, i32
  }
  func.func @transform_3(%arg0: i32, %arg1: i32) -> (i32, i32) {
    %c0_i32 = arith.constant 0 : i32
    %c0_i32_0 = arith.constant 0 : i32
    %c0_i32_1 = arith.constant 0 : i32
    return %c0_i32, %c0_i32_0 : i32, i32
  }
  func.func @transform_4(%arg0: i32, %arg1: i32) -> (i32, i32) {
    %c0_i32 = arith.constant 0 : i32
    %c0_i32_0 = arith.constant 0 : i32
    %c0_i32_1 = arith.constant 0 : i32
    return %c0_i32, %c0_i32_0 : i32, i32
  }
  func.func @transform_5(%arg0: i32, %arg1: i32) -> (i32, i32) {
    %c0_i32 = arith.constant 0 : i32
    %c0_i32_0 = arith.constant 0 : i32
    %c0_i32_1 = arith.constant 0 : i32
    return %c0_i32, %c0_i32_0 : i32, i32
  }
  func.func @transform_6(%arg0: i32, %arg1: i32) -> (i32, i32) {
    %c0_i32 = arith.constant 0 : i32
    %c0_i32_0 = arith.constant 0 : i32
    %c0_i32_1 = arith.constant 0 : i32
    return %c0_i32, %c0_i32_0 : i32, i32
  }
  func.func @transform_7(%arg0: i32, %arg1: i32) -> (i32, i32, i32) {
    %c0_i32 = arith.constant 0 : i32
    %c0_i32_0 = arith.constant 0 : i32
    %c0_i32_1 = arith.constant 0 : i32
    return %arg0, %c0_i32, %c0_i32_0 : i32, i32, i32
  }
}

</mosaic_0001>

<bundles_post_ra>
// kernel: tpu_custom_call.1
= control target key start
LH: loop header
LB: loop body
LE: loop exit
PB: predicated region body
PF: predicated region fallthrough
CT: control target
= control target key end

     0   :  { %12 = vsyncpa [#allocation4], 0  ;;  %s1123_s0 = inlined_call_operand.vmem [shape: f32[2,4,256], index: 0, kind: input, shape index: {}]   ;;  %s1124_s1 = inlined_call_operand.vmem [shape: f32[2,4,256], index: 1, kind: input, shape index: {}]   ;;  %s1125_s2 = inlined_call_operand.vmem [shape: f32[8,4], index: 2, kind: input, shape index: {}]   ;;  %s1126_s3 = inlined_call_operand.vmem [shape: f32[8,4], index: 3, kind: input, shape index: {}]   ;;  %s1127_s4 = inlined_call_operand.vmem [shape: f32[8,1], index: 4, kind: input, shape index: {}]   ;;  %s1128_s5 = inlined_call_operand.vmem [shape: f32[8,4], index: 5, kind: input, shape index: {}]   ;;  %s1129_s6 = inlined_call_operand.vmem [shape: f32[8,4], index: 6, kind: input, shape index: {}]   ;;  %s1130_s7 = inlined_call_operand.hbm [shape: f32[2,8,256], index: 7, kind: output, shape index: {}]  }
   0x1   :  { %14 = vsyncpa [#allocation4 + $0x1], 0  ;;  %s961_s24 = smov 0   ;;  %s963_s25 = smov 0  }
   0x2   :  { %s965_s26 = smov 0   ;;  %s967_s27 = smov 0  }
   0x3   :  { %s969_s28 = smov 0   ;;  %s971_s29 = smov 0  }
   0x4   :  { %s973_s30 = smov 0   ;;  %s975_s8 = smov 0  }
   0x5 LB: > { %1134 = sst [smem:[#allocation6_spill]] %s901_s29  ;;  %s680_s9 = sadd.s32 4294967295, %s909_s8   ;;  %s909_s8 = sphi %s975_s8, %s20_s8   ;;  %s905_s30 = sphi %s973_s30, %s1143_s30   ;;  %s901_s29 = sphi %s971_s29, %s1142_s29   ;;  %s897_s28 = sphi %s969_s28, %s1141_s28   ;;  %s893_s27 = sphi %s967_s27, %s1140_s27   ;;  %s889_s26 = sphi %s965_s26, %s1146_s26   ;;  %s885_s25 = sphi %s963_s25, %s1145_s25   ;;  %s881_s24 = sphi %s961_s24, %s1144_s24  }
   0x6   : > { %1135 = sst [smem:[#allocation7_spill]] %s905_s30  ;;  %s681_s10 = sadd.s32 4294967294, %s909_s8  }
   0x7   : > { %s29_s11 = sadd.s32 1, %s901_s29  ;;  %s32_s12 = sadd.s32 1, %s905_s30 }
   0x8   : > { %p30_p0 = scmp.ge.s32.totalorder %s29_s11, 2  ;;  %p210_p1 = scmp.ne.s32.totalorder %s889_s26, %s885_s25 }
   0x9   : > { %p211_p2 = scmp.eq.s32.totalorder %s680_s9, 3  ;;  %p216_p4 = scmp.ne.s32.totalorder %s885_s25, %s881_s24 }
   0xa   : > { %s1148_s11 = smov (%p30_p0, %s29_s11), 0  ;;  %s1150_s12 = smov (!%p30_p0, %s32_s12), %s905_s30 }
   0xb   : > { %1136 = sst [smem:[#allocation8_spill]] %s1148_s11  ;;  %p1010_p3 = por %p211_p2, %p210_p1 }
   0xc   : > { %p34_p5 = scmp.ge.s32.totalorder %s1150_s12, 2  ;;  %p217_p6 = scmp.eq.s32.totalorder %s681_s10, 3 }
   0xd   : > { %p684_p7 = scmp.ge.s32.totalorder %s909_s8, 1  ;;  %p272_p8 = scmp.lt.s32.totalorder %s909_s8, 5 }
   0xe   : > { %s1152_s12 = smov (%p34_p5, %s1150_s12), 0  ;;  %p1020_p9 = por %p217_p6, %p216_p4 }
   0xf   : > { %1138 = sst [smem:[#allocation9_spill]] %s1152_s12  ;;  %p273_p10 = pnand %p684_p7, %p272_p8 }
  0x10   : > { %s197_s15 = ssub.s32 %s905_s30, %s1152_s12  ;;  %s200_s16 = sadd.s32 1, %s889_s26 }
  0x11   : > { %p198_p11 = scmp.eq.s32.totalorder %s197_s15, 0  ;;  %276 = sbr.rel (%p273_p10) target bundleno = 760 (0x2f8), region = 48 }
  0x12   : > { %s312_s18 = sand.u32 (!%p273_p10), 1, %s885_s25   ;;  %p315_p12 = scmp.lt.s32.totalorder (!%p273_p10), %s897_s28, 1 }
  0x13   : > { %s1028_s17 = scalar_select %p198_p11, %s889_s26, %s200_s16  }
  0x14   : > { %s685_s19 = sshll.u32 (!%p273_p10), %s312_s18, 4  ;;  %p317_p13 = scmp.lt.s32.totalorder (!%p273_p10), %s893_s27, 1 }
  0x15   : > { %s1043_s29 = scalar_lea.vmem (!%p273_p10), [#allocation3], %s685_s19  ;;  %p690_p0 = scmp.ne.s32.totalorder (!%p273_p10), %s893_s27, 0 }
  0x18   : > { %s316_s20 = scalar_select %p315_p12, %s897_s28, 1 }
  0x19   : > { %s318_s21 = scalar_select %p317_p13, %s893_s27, 1 }
  0x1a   : > { %s686_s22 = sshll.u32 %s316_s20, 1  ;;  %334 = sbr.rel (%p690_p0) target bundleno = 33 (0x21), region = 52  ;;  %vm335_vm0 = vcmask (!%p690_p0), 7168   ;;  %v915_v0 = vmov (!%p690_p0), 0.0  }
  0x1b   : > { %s320_s23 = sadd.s32 %s686_s22, %s318_s21  ;;  %336 = vst.msk [vmem:[#allocation2] sm:$0xff] (!%p690_p0), %vm335_vm0, %v915_v0 }
  0x1c   : > { %s687_s9 = sshll.u32 %s320_s23, 2 }
  0x1d   : > { %s322_s16 = scalar_lea.vmem %s1123_s0, %s687_s9  ;;  %s330_s30 = scalar_lea.vmem %s1124_s1, %s687_s9 }
  0x21 PF: > { %v340_v1 = vld [vmem:[%s330_s30] sm:$0xf]  ;;  %vm345_vm1 = vcmask 1043456   ;;  %v916_v2 = vmov 0.0   ;;  %vm341_vm2 = vcmask 31744   ;;  %vm917_vm3 = vmmov 0  }
  0x22   : > { %711 = vmatprep.subr.mxu0 %v916_v2  ;;  %716 = vmatprep.subr.mxu1 %v916_v2  ;;  %v338_v3 = vld [vmem:[%s322_s16] sm:$0xf]  ;;  %v918_v7 = vmov 0   ;;  %s695_s22 = sshll.u32 %s893_s27, 7  ;;  %vm513_vm4 = vcmask 7168   ;;  %p697_p1 = scmp.ne.s32.totalorder %s893_s27, 1 }
  0x23   : > { %v339_v4 = vld [vmem:[%s1126_s3] sm:$0xff]  ;;  %712 = vmatpush3.msk.msra.mxu0 %vm345_vm1, %v340_v1  ;;  %713 = vmatprep.mubr.msk.f32.mxu0 %vm917_vm3, %v916_v2  ;;  %s504_s23 = sshra.s32 %s695_s22, 7  ;;  %v919_v20 = vmov (!%p697_p1), 0   ;;  %s911_s21 = smov (!%p697_p1), 0  }
  0x24   : > { %v337_v5 = vld [vmem:[%s1125_s2] sm:$0xff]  ;;  %717 = vmatpush3.msk.msra.mxu1 %vm345_vm1, %v338_v3  ;;  %718 = vmatprep.mubr.msk.f32.mxu1 %vm917_vm3, %v916_v2  ;;  %s696_s9 = sshll.u32 %s504_s23, 3 }
  0x25   : > { %v495_v6 = vld [vmem:[%s1127_s4] sm:$0xff]  ;;  %714 = vmatmul.mubr.msk.f32.vlgmr.msra.gmra.mrb[0].mxu0 %vm341_vm2, %v339_v4  ;;  %719 = vmatmul.mubr.msk.f32.vlgmr.msra.gmra.mrb[0].mxu1 %vm341_vm2, %v337_v5  ;;  %s507_s10 = scalar_lea.vmem %s1043_s29, %s696_s9 [#allocation3] }
  0x26   : > { %805 = vset.pattern.permute.xlu0 %v918_v7  ;;  %v509_v16 = vld [vmem:[#allocation2] sm:$0xff] }
  0x27   : > { %498 = vperm.xlu0 %805, %v495_v6   ;;  %v521_v22 = vld [vmem:[%s1128_s5] sm:$0xff] (!%p697_p1) }
  0x28   : > { %v522_v32 = vld [vmem:[%s1129_s6] sm:$0xff] (!%p697_p1) }
  0x2b   : > { %806 = vset.pattern.permute.xlu0 (!%p697_p1), %v919_v20 }
  0xa6   : > { %v499_v8 = vpop.permute.xlu0 %498 }
  0xf8   : > { %v415_v9 = vpop.f32.mrb[0].mxu0  ;;  %v491_v10 = vpop.f32.mrb[0].mxu1 }
  0xf9   : > { %v492_v11 = vadd.f32 %v491_v10, %v415_v9  ;;  %v715_v12 = vpop.f32.mrb[1].mxu0  ;;  %v720_v13 = vpop.f32.mrb[1].mxu1 }
  0xfb   : > { %v501_v14 = vadd.f32 %v499_v8, %v492_v11 }
  0xfd   : > { %v502_v15 = vmax.f32 %v501_v14, 0.0 }
  0xff   : > { %508 = vst [vmem:[%s507_s10] sm:$0xff] %v502_v15  ;;  %510 = vadd.xlane.f32.xlu0 %v502_v15 }
 0x189   : > { %518 = sbr.rel (%p697_p1) target bundleno = 736 (0x2e0), region = 56 }
 0x18c   : > { %v511_v17 = vpop.xlane.xlu0 %510 }
 0x18d   : > { %v512_v18 = vadd.f32 %v511_v17, %v509_v16 }
 0x18f   : > { %514 = vst.msk [vmem:[#allocation2] sm:$0xff] %vm513_vm4, %v512_v18 }
 0x196   : > { %v519_v19 = vld [vmem:[#allocation2] sm:$0xff] }
 0x197   : > { %v520_v21 = vmul.f32 0.00390625, %v519_v19 }
 0x199   : > { %525 = vperm.xlu0 %806, %v520_v21  }
 0x218   : > { %v526_v23 = vpop.permute.xlu0 %525 }
 0x219   : > { %v528_v24 = vmul.f32 %v526_v23, %v521_v22 }
 0x21b   : > { %v529_v25 = vsel %vm341_vm2, %v528_v24, 0.0 }
 0x21c   : > { %v530_v26 = vrot.slane %v529_v25, 4 }
 0x21e   : > { %v531_v27 = vadd.f32 %v530_v26, %v529_v25 }
 0x220   : > { %v532_v28 = vrot.slane %v531_v27, 2 }
 0x222   : > { %v533_v29 = vadd.f32 %v532_v28, %v531_v27 }
 0x224   : > { %v534_v30 = vrot.slane %v533_v29, 1 }
 0x226   : > { %v535_v31 = vadd.f32 %v534_v30, %v533_v29 }
 0x228   : > { %v536_v33 = vmax.f32 %v535_v31, 0.0 }
 0x22a   : > { %v537_v34 = vmul.f32 %v536_v33, %v522_v32 }
 0x22c   : > { %v538_v35 = vsel %vm341_vm2, %v537_v34, 0.0 }
 0x22d   : > { %539 = vadd.xlane.f32.xlu0 %v538_v35 }
 0x2ba   : > { %v540_v36 = vpop.xlane.xlu0 %539 }
 0x2bb   : > { %v698_v37 = vmul.f32 -1.442695, %v540_v36 }
 0x2bd   : > { %807 = vpow2.f32 %v698_v37 }
 0x2c7   : > { %v808_v38 = vpop.eup %807 }
 0x2c8   : > { %v544_v39 = vadd.f32 1.0, %v808_v38 }
 0x2ca   : > { %809 = vrcp.f32 %v544_v39 }
 0x2d4   : > { %v810_v40 = vpop.eup %809 }
 0x2d5   : > { %v547_v41 = vadd.f32 1.0, %v810_v40 }
 0x2d6 LB: >> { %s699_s11 = sshll.u32 %s913_s21, 7  ;;  %s553_s21 = sadd.s32 1, %s913_s21   ;;  %s913_s21 = sphi %s911_s21, %s553_s21  }
 0x2d7   : >> { %s555_s12 = sshra.s32 %s699_s11, 7  ;;  %p550_p2 = scmp.ge.s32.totalorder %s553_s21, 2  }
 0x2d8   : >> { %s700_s30 = sshll.u32 %s555_s12, 3 }
 0x2d9   : >> { %s558_s19 = scalar_lea.vmem %s1043_s29, %s700_s30 [#allocation3]  ;;  %552 = sbr.rel (!%p550_p2) target bundleno = 726 (0x2d6), region = 103 }
 0x2da   : >> { %v559_v42 = vld [vmem:[%s558_s19] sm:$0xff] }
 0x2db   : >> { %v560_v43 = vmul.f32 %v559_v42, %v547_v41 }
 0x2dd   : >> { %561 = vst [vmem:[%s558_s19] sm:$0xff] %v560_v43 }
 0x2e0 PF: > { %s706_s22 = sshll.u32 %s897_s28, 8  ;;  %s577_s15 = sshll.u32 %s1043_s29, 4  ;;  %s578_s15 = int_to_ptr.vmem [resolvable:$true] %s577_s15 }
 0x2e1   : > { %s1073_s10 = scalar_lea.hbm %s1130_s7, %s706_s22  ;;  %s563_s16 = scalar_lea.sflag [#allocation4], %s312_s18 }
 0x2e2   : > { %s811_s27 = scalar_lea.vmem %s578_s15, 256  ;;  %s920_s20 = smov [#allocation3]  }
 0x2e3   : > { %p812_p4 = scmp.ne.s32.totalorder %s578_s15, %s811_s27  ;;  %s815_s21 = sshll.u32 %s920_s20, 4  ;;  %s816_s21 = int_to_ptr.vmem [resolvable:$false] %s815_s21 }
 0x2e4   : > { %s817_s11 = scalar_lea.vmem %s816_s21, 512  ;;  %p818_p7 = scmp.lt.s32.totalorder %s578_s15, %s816_s21 }
 0x2e5   : > { %p813_p5 = pnand %p812_p4, %p1010_p3  ;;  %p819_p8 = scmp.lt.s32.totalorder %s817_s11, %s811_s27 }
 0x2e7   : > { %p814_p6 = pneg %p813_p5  ;;  %p820_p10 = por %p819_p8, %p818_p7 }
 0x2e9   : > { %p821_p11 = pnand %p820_p10, %p814_p6 }
 0x2eb   : > { %824 = shalt.err (!%p821_p11)
}
 0x2ec   : > { %s825_s28 = scalar_lea.hbm %s1073_s10, 256  ;;  %s829_s12 = scalar_lea.hbm %s1130_s7, 512 }
 0x2ed   : > { %p826_p12 = scmp.ne.s32.totalorder %s1073_s10, %s825_s28  ;;  %p830_p1 = scmp.lt.u32.totalorder %s1073_s10, %s1130_s7 }
 0x2ee   : > { %p831_p2 = scmp.lt.u32.totalorder %s829_s12, %s825_s28  ;;  %p833_p5 = scmp.lt.u32.totalorder %s825_s28, %s1073_s10 }
 0x2ef   : > { %p827_p13 = pnand %p826_p12, %p1010_p3 }
 0x2f0   : > { %p832_p4 = por %p831_p2, %p830_p1 }
 0x2f1   : > { %p828_p0 = pneg %p827_p13 }
 0x2f2   : > { %p834_p6 = por %p833_p5, %p832_p4 }
 0x2f4   : > { %p835_p7 = pnand %p834_p6, %p828_p0 }
 0x2f6   : > { %838 = shalt.err (!%p835_p7)
}
 0x2f7   : > { %721 = dma.vmem_to_hbm [thread:$0]  (%p1010_p3), %s578_s15, 256, %s1073_s10, %s563_s16  }
 0x2f8 PF: > { %p727_p8 = scmp.ge.s32.totalorder %s909_s8, 2  ;;  %s589_s22 = sand.u32 1, %s881_s24  }
 0x2f9   : > { %s590_s23 = scalar_lea.sflag [#allocation4], %s589_s22 }
 0x2fa   : > { %p724_p10 = pnand %p727_p8, %p1020_p9 }
 0x2fc   : > { %876 = dma.done.wait (!%p724_p10), %s590_s23, 256  }
 0x2fd   : > { %878 = vsyncadd (!%p724_p10), %s590_s23, 4294967040  ;;  %s20_s8 = sadd.s32 1, %s909_s8   ;;  %s1140_s27 = sld [smem:[#allocation6_spill]] }
 0x2fe   : > { %p17_p11 = scmp.ge.s32.totalorder %s20_s8, 6   ;;  %s1141_s28 = sld [smem:[#allocation7_spill]] }
 0x2ff   : > { %s1142_s29 = sld [smem:[#allocation8_spill]]  ;;  %s1143_s30 = sld [smem:[#allocation9_spill]] }
 0x300   : > { %s1144_s24 = smov %s885_s25  ;;  %s1145_s25 = smov %s889_s26 }
 0x301   : > { %s1146_s26 = smov %s1028_s17  ;;  %19 = sbr.rel (!%p17_p11) target bundleno = 5 (0x5), region = 114 }
 0x308   :  { %595 = vsyncpa [#allocation4], 1 }
 0x309   :  { %597 = vsyncpa [#allocation4 + $0x1], 1 }

</bundles_post_ra>
